<compile_context>
chip_gen: v5e
topology: v5e:2x2
jax: 0.10.0
libtpu: 0.0.40
codegen_flags: <defaults>
</compile_context>

<pallas_src>
import functools

import numpy as np
import jax
import jax.numpy as jnp
from jax.experimental import pallas as pl
from jax.experimental.pallas import tpu as pltpu


# ---------------------------------------------------------------------------
# Kernel math (shared by both kernels)
# ---------------------------------------------------------------------------
def _lgkd_rows(new, old, tgt, *, c_old, c_new, alpha, prev_kd, novel_kd):
    """Per-pixel weighted KD loss for one pixel tile (classes on sublanes).

    new: (C_new, T) logits, old: (C_old, T) logits, tgt: (1, T) int32.
    Returns (weighted_loss (1, T) f32, valid (1, T) bool).
    """
    if new.dtype != jnp.float32:          # trace-time guard (bf16 inputs ok)
        new = new.astype(jnp.float32)
    if old.dtype != jnp.float32:
        old = old.astype(jnp.float32)
    if alpha != 1.0:                      # skip the VPU pass when alpha == 1
        old = old * alpha

    # replicate `targets[targets < C_old] = 0` (255 stays 255 -> ignored)
    t_eff = jnp.where(tgt < c_old, 0, tgt)                    # (1, T) int32
    valid = t_eff != 255
    is_novel = jnp.logical_and(valid, t_eff >= c_old)

    # softmax(old) over the class (sublane) axis
    old = old - jnp.max(old, axis=0, keepdims=True)
    e_old = jnp.exp(old)
    denom = jnp.sum(e_old, axis=0, keepdims=True)             # (1, T)
    p_old = e_old * pl.reciprocal(denom, approx=True)         # (C_old, T)

    # log-softmax(new) over the class axis
    m = jnp.max(new, axis=0, keepdims=True)
    lse = m + jnp.log(jnp.sum(jnp.exp(new - m), axis=0, keepdims=True))
    logp_new = new - lse                                      # (C_new, T)

    logp_prev = logp_new[:c_old, :]                           # static slice
    base = jnp.sum(p_old * logp_prev, axis=0, keepdims=True)  # (1, T)

    if c_new > c_old:
        # novel pixels: drop the class-0 term, add p_bg * logp_new[target]
        # (gather restricted to the novel columns only — targets of novel
        #  pixels are always >= c_old)
        p_bg = p_old[0:1, :]
        logp0 = logp_prev[0:1, :]
        logp_nov = logp_new[c_old:, :]                        # (C_new-C_old, T)
        cls_ids = jax.lax.broadcasted_iota(jnp.int32, logp_nov.shape, 0) + c_old
        logp_at_t = jnp.sum(jnp.where(cls_ids == t_eff, logp_nov, 0.0),
                            axis=0, keepdims=True)            # (1, T)
        novel_loss = base + p_bg * (logp_at_t - logp0)
        loss = jnp.where(is_novel, novel_loss, base)
    else:
        loss = base

    w = jnp.where(valid, jnp.where(is_novel, novel_kd, prev_kd), 0.0)
    return w * loss, valid


def _lgkd_partial_kernel(new_ref, old_ref, tgt_ref, part_ref, *,
                         c_old, c_new, alpha, prev_kd, novel_kd):
    """Per-tile partials: lane 0 = weighted-loss sum, lane 1 = valid count."""
    wloss, valid = _lgkd_rows(new_ref[0], old_ref[0], tgt_ref[0],
                              c_old=c_old, c_new=c_new, alpha=alpha,
                              prev_kd=prev_kd, novel_kd=novel_kd)
    wsum = jnp.sum(wloss, axis=1, keepdims=True)                      # (1, 1)
    cnt = jnp.sum(valid.astype(jnp.float32), axis=1, keepdims=True)   # (1, 1)
    lane = jax.lax.broadcasted_iota(jnp.int32, (1, 128), 1)
    out = jnp.where(lane == 0, wsum, 0.0) + jnp.where(lane == 1, cnt, 0.0)
    part_ref[0] = out.astype(part_ref.dtype)


def _lgkd_pixel_kernel(new_ref, old_ref, tgt_ref, loss_ref, *,
                       c_old, c_new, alpha, prev_kd, novel_kd):
    """Per-pixel weighted loss (reduction='none' path), lane-dense output."""
    wloss, _ = _lgkd_rows(new_ref[0], old_ref[0], tgt_ref[0],
                          c_old=c_old, c_new=c_new, alpha=alpha,
                          prev_kd=prev_kd, novel_kd=novel_kd)
    loss_ref[0] = wloss.astype(loss_ref.dtype)


# ---------------------------------------------------------------------------
# Tile picker (flipped layout: pixels on lanes -> tile is a lane count)
# ---------------------------------------------------------------------------
def _pick_tile(hw, c_new, c_old, *, vmem_budget_bytes=20 * 2**20, tmax=8192):
    """Largest multiple-of-128 pixel tile fitting the VMEM budget (v7x-safe)."""
    def pad8(c):
        return -(-c // 8) * 8
    # double-buffered input tiles (new + old + int32 targets padded to 8
    # sublanes) + ~6 f32 (C_new_pad, TPIX) temporaries, all physical sizes.
    bytes_per_pixel = 4 * (2 * (pad8(c_new) + pad8(c_old) + 8) + 6 * pad8(c_new))
    hw128 = -(-hw // 128) * 128
    t = max(128, min(tmax, vmem_budget_bytes // bytes_per_pixel, hw128))
    return (t // 128) * 128


# ---------------------------------------------------------------------------
# Wrapper
# ---------------------------------------------------------------------------
def lgkd_loss_pallas(new_logits, old_logits, targets, *, reduction='mean',
                     alpha=1.0, prev_kd=10.0, novel_kd=1.0, tpix=None):
    """new_logits (B,Cn,H,W), old_logits (B,Co,H,W), targets (B,H,W)."""
    b, c_new, h, w = new_logits.shape
    c_old = old_logits.shape[1]
    hw = h * w

    # free reshapes: natural NCHW flattening, no HBM relayout
    new3 = new_logits.reshape(b, c_new, hw)
    old3 = old_logits.reshape(b, c_old, hw)
    tgt3 = targets.astype(jnp.int32).reshape(b, 1, hw)

    if tpix is None:
        tpix = _pick_tile(hw, c_new, c_old)
    hw_pad = pl.cdiv(hw, tpix) * tpix
    if hw_pad != hw:
        pad = hw_pad - hw
        new3 = jnp.pad(new3, ((0, 0), (0, 0), (0, pad)))
        old3 = jnp.pad(old3, ((0, 0), (0, 0), (0, pad)))
        tgt3 = jnp.pad(tgt3, ((0, 0), (0, 0), (0, pad)), constant_values=255)
    nt = hw_pad // tpix

    in_specs = [
        pl.BlockSpec((1, c_new, tpix), lambda bi, pi: (bi, 0, pi)),  # new logits
        pl.BlockSpec((1, c_old, tpix), lambda bi, pi: (bi, 0, pi)),  # old logits
        pl.BlockSpec((1, 1, tpix), lambda bi, pi: (bi, 0, pi)),      # targets
    ]
    cparams = pltpu.CompilerParams(
        dimension_semantics=("parallel", "parallel"),   # no serialized accum
        vmem_limit_bytes=48 * 1024 * 1024)              # safe on v5e/v6e/v7x

    kw = dict(c_old=c_old, c_new=c_new, alpha=float(alpha),
              prev_kd=float(prev_kd), novel_kd=float(novel_kd))

    if reduction in ('mean', 'sum'):
        kernel = functools.partial(_lgkd_partial_kernel, **kw)
        partials = pl.pallas_call(
            kernel,
            out_shape=jax.ShapeDtypeStruct((b, 1, nt * 128), jnp.float32),
            grid_spec=pltpu.PrefetchScalarGridSpec(
                num_scalar_prefetch=0,
                grid=(b, nt),
                in_specs=in_specs,
                out_specs=pl.BlockSpec((1, 1, 128), lambda bi, pi: (bi, 0, pi)),
            ),
            compiler_params=cparams,
        )(new3, old3, tgt3)
        flat = partials.reshape(-1, 128)
        weighted_sum = jnp.sum(flat[:, 0])
        if reduction == 'sum':
            return -weighted_sum
        count = jnp.sum(flat[:, 1])
        return -weighted_sum / count
    else:
        kernel = functools.partial(_lgkd_pixel_kernel, **kw)
        per_pix = pl.pallas_call(
            kernel,
            out_shape=jax.ShapeDtypeStruct((b, 1, hw_pad), jnp.float32),
            grid_spec=pltpu.PrefetchScalarGridSpec(
                num_scalar_prefetch=0,
                grid=(b, nt),
                in_specs=in_specs,
                out_specs=pl.BlockSpec((1, 1, tpix), lambda bi, pi: (bi, 0, pi)),
            ),
            compiler_params=cparams,
        )(new3, old3, tgt3)
        # TODO(synk): reference 'none' returns the filtered/reordered vector;
        # here: per-pixel weighted losses in original order, ignored pixels = 0.
        return -per_pix[:, 0, :hw].reshape(-1)


# ---------------------------------------------------------------------------
# NumPy reference mirroring the PyTorch forward literally
# ---------------------------------------------------------------------------
def lgkd_loss_ref(new_logits, old_logits, targets, *, reduction='mean',
                  alpha=1.0, prev_kd=10.0, novel_kd=1.0):
    new_logits = np.asarray(new_logits, dtype=np.float64)
    old_logits = np.asarray(old_logits, dtype=np.float64)
    t = np.array(targets, dtype=np.int64)

    c_old = old_logits.shape[1]
    c_new = new_logits.shape[1]
    t = t.copy()
    t[t < c_old] = 0
    new2d = np.transpose(new_logits, (0, 2, 3, 1)).reshape(-1, c_new)
    old2d = np.transpose(old_logits, (0, 2, 3, 1)).reshape(-1, c_old)
    t = t.reshape(-1)
    keep = t != 255
    t, new2d, old2d = t[keep], new2d[keep], old2d[keep]
    new_cl = c_new - c_old
    old2d = old2d * alpha
    novel = t >= c_old
    prev = t < c_old

    def softmax(x):
        x = x - x.max(axis=1, keepdims=True)
        e = np.exp(x)
        return e / e.sum(axis=1, keepdims=True)

    def logsumexp(x):
        m = x.max(axis=1, keepdims=True)
        return (m + np.log(np.exp(x - m).sum(axis=1, keepdims=True)))[:, 0]

    nl_n, ol_n, t_n = new2d[novel], old2d[novel], t[novel]
    nl_p, ol_p = new2d[prev], old2d[prev]

    op_n = softmax(ol_n)
    op_n = np.concatenate([op_n, np.zeros((op_n.shape[0], new_cl))], axis=1)
    op_n[np.arange(op_n.shape[0]), t_n] = op_n[:, 0]
    op_n[:, 0] = 0
    loss_novel = (op_n * (nl_n - logsumexp(nl_n)[:, None])).sum(axis=1)

    op_p = softmax(ol_p)
    op_p = np.concatenate([op_p, np.zeros((op_p.shape[0], new_cl))], axis=1)
    loss_prev = (op_p * (nl_p - logsumexp(nl_p)[:, None])).sum(axis=1)

    loss = np.concatenate([prev_kd * loss_prev, novel_kd * loss_novel], axis=0)
    if reduction == 'mean':
        return -loss.mean()
    elif reduction == 'sum':
        return -loss.sum()
    return -loss


if __name__ == "__main__":
    B, C_OLD, C_NEW, H, W = 2, 16, 20, 16, 16
    key = jax.random.PRNGKey(0)
    k1, k2, k3, k4 = jax.random.split(key, 4)
    new_logits = jax.random.normal(k1, (B, C_NEW, H, W), dtype=jnp.float32)
    old_logits = jax.random.normal(k2, (B, C_OLD, H, W), dtype=jnp.float32)
    targets = jax.random.randint(k3, (B, H, W), 0, C_NEW, dtype=jnp.int32)
    ignore = jax.random.bernoulli(k4, 0.1, (B, H, W))
    targets = jnp.where(ignore, jnp.int32(255), targets)   # sprinkle ignore label

    loss = lgkd_loss_pallas(new_logits, old_logits, targets,
                            reduction='mean', alpha=1.0, prev_kd=10, novel_kd=1)
    loss = jax.block_until_ready(loss)

    ref = lgkd_loss_ref(new_logits, old_logits, targets,
                        reduction='mean', alpha=1.0, prev_kd=10, novel_kd=1)
    # 1e-3 tolerance: kernel computes in f32 and uses the ~12-bit approximate
    # EUP reciprocal for the old-softmax denominator (per perf review).
    assert np.allclose(np.asarray(loss), ref, rtol=1e-3, atol=1e-3), (loss, ref)
    print("KERNEL_OK")
</pallas_src>

<mosaic_0001>
module attributes {stable_mosaic.version = 11 : i64} {
  func.func @_lgkd_partial_kernel(%arg0: i32, %arg1: i32, %arg2: memref<1x20x256xf32, #tpu.memory_space<vmem>>, %arg3: memref<1x16x256xf32, #tpu.memory_space<vmem>>, %arg4: memref<1x1x256xi32, #tpu.memory_space<vmem>>, %arg5: memref<1x1x128xf32, #tpu.memory_space<vmem>>) attributes {dimension_semantics = [#tpu.dimension_semantics<parallel>, #tpu.dimension_semantics<parallel>], iteration_bounds = array<i64: 2, 1>, scalar_prefetch = 0 : i64, scratch_operands = 0 : i64, tpu.core_type = #tpu.core_type<tc>, window_params = [{transform_indices = @transform_0, window_bounds = array<i64: 1, 20, 256>}, {transform_indices = @transform_1, window_bounds = array<i64: 1, 16, 256>}, {transform_indices = @transform_2, window_bounds = array<i64: 1, 1, 256>}, {transform_indices = @transform_3, window_bounds = array<i64: 1, 1, 128>}]} {
    %c0 = arith.constant 0 : index
    %c0_0 = arith.constant 0 : index
    %c0_1 = arith.constant 0 : index
    %0 = vector.load %arg2[%c0, %c0_0, %c0_1] : memref<1x20x256xf32, #tpu.memory_space<vmem>>, vector<1x20x256xf32>
    %1 = vector.shape_cast %0 : vector<1x20x256xf32> to vector<20x256xf32>
    %c0_2 = arith.constant 0 : index
    %c0_3 = arith.constant 0 : index
    %c0_4 = arith.constant 0 : index
    %2 = vector.load %arg3[%c0_2, %c0_3, %c0_4] : memref<1x16x256xf32, #tpu.memory_space<vmem>>, vector<1x16x256xf32>
    %3 = vector.shape_cast %2 : vector<1x16x256xf32> to vector<16x256xf32>
    %c0_5 = arith.constant 0 : index
    %c0_6 = arith.constant 0 : index
    %c0_7 = arith.constant 0 : index
    %4 = vector.load %arg4[%c0_5, %c0_6, %c0_7] : memref<1x1x256xi32, #tpu.memory_space<vmem>>, vector<1x1x256xi32>
    %5 = vector.shape_cast %4 : vector<1x1x256xi32> to vector<1x256xi32>
    %c16_i32 = arith.constant 16 : i32
    %6 = vector.broadcast %c16_i32 : i32 to vector<1x256xi32>
    %7 = arith.cmpi slt, %5, %6 : vector<1x256xi32>
    %c0_i32 = arith.constant 0 : i32
    %8 = vector.broadcast %c0_i32 : i32 to vector<1x256xi32>
    %9 = arith.select %7, %8, %5 : vector<1x256xi1>, vector<1x256xi32>
    %c255_i32 = arith.constant 255 : i32
    %10 = vector.broadcast %c255_i32 : i32 to vector<1x256xi32>
    %11 = arith.cmpi ne, %9, %10 : vector<1x256xi32>
    %c16_i32_8 = arith.constant 16 : i32
    %12 = vector.broadcast %c16_i32_8 : i32 to vector<1x256xi32>
    %13 = arith.cmpi sge, %9, %12 : vector<1x256xi32>
    %14 = arith.andi %11, %13 : vector<1x256xi1>
    %cst = arith.constant dense<0xFF800000> : vector<256xf32>
    %15 = vector.multi_reduction <maximumf>, %3, %cst [0] : vector<16x256xf32> to vector<256xf32>
    %16 = vector.shape_cast %15 : vector<256xf32> to vector<1x256xf32>
    %17 = vector.broadcast %16 : vector<1x256xf32> to vector<16x256xf32>
    %18 = arith.subf %3, %17 : vector<16x256xf32>
    %19 = math.exp %18 : vector<16x256xf32>
    %cst_9 = arith.constant dense<0.000000e+00> : vector<256xf32>
    %20 = vector.multi_reduction <add>, %19, %cst_9 [0] : vector<16x256xf32> to vector<256xf32>
    %21 = vector.shape_cast %20 : vector<256xf32> to vector<1x256xf32>
    %22 = tpu.reciprocal %21 {approx = true} : vector<1x256xf32> -> vector<1x256xf32>
    %23 = vector.broadcast %22 : vector<1x256xf32> to vector<16x256xf32>
    %24 = arith.mulf %19, %23 : vector<16x256xf32>
    %cst_10 = arith.constant dense<0xFF800000> : vector<256xf32>
    %25 = vector.multi_reduction <maximumf>, %1, %cst_10 [0] : vector<20x256xf32> to vector<256xf32>
    %26 = vector.shape_cast %25 : vector<256xf32> to vector<1x256xf32>
    %27 = vector.broadcast %26 : vector<1x256xf32> to vector<20x256xf32>
    %28 = arith.subf %1, %27 : vector<20x256xf32>
    %29 = math.exp %28 : vector<20x256xf32>
    %cst_11 = arith.constant dense<0.000000e+00> : vector<256xf32>
    %30 = vector.multi_reduction <add>, %29, %cst_11 [0] : vector<20x256xf32> to vector<256xf32>
    %31 = vector.shape_cast %30 : vector<256xf32> to vector<1x256xf32>
    %32 = math.log %31 : vector<1x256xf32>
    %33 = arith.addf %26, %32 : vector<1x256xf32>
    %34 = vector.broadcast %33 : vector<1x256xf32> to vector<20x256xf32>
    %35 = arith.subf %1, %34 : vector<20x256xf32>
    %36 = vector.extract_strided_slice %35 {offsets = [0, 0], sizes = [16, 256], strides = [1, 1]} : vector<20x256xf32> to vector<16x256xf32>
    %37 = arith.mulf %24, %36 : vector<16x256xf32>
    %cst_12 = arith.constant dense<0.000000e+00> : vector<256xf32>
    %38 = vector.multi_reduction <add>, %37, %cst_12 [0] : vector<16x256xf32> to vector<256xf32>
    %39 = vector.shape_cast %38 : vector<256xf32> to vector<1x256xf32>
    %40 = vector.extract_strided_slice %24 {offsets = [0, 0], sizes = [1, 256], strides = [1, 1]} : vector<16x256xf32> to vector<1x256xf32>
    %41 = vector.extract_strided_slice %36 {offsets = [0, 0], sizes = [1, 256], strides = [1, 1]} : vector<16x256xf32> to vector<1x256xf32>
    %42 = vector.extract_strided_slice %35 {offsets = [16, 0], sizes = [4, 256], strides = [1, 1]} : vector<20x256xf32> to vector<4x256xf32>
    %43 = tpu.iota {dimensions = array<i32: 0>} : vector<4x256xi32>
    %c16_i32_13 = arith.constant 16 : i32
    %44 = vector.broadcast %c16_i32_13 : i32 to vector<4x256xi32>
    %45 = arith.addi %43, %44 : vector<4x256xi32>
    %46 = vector.broadcast %9 : vector<1x256xi32> to vector<4x256xi32>
    %47 = arith.cmpi eq, %45, %46 : vector<4x256xi32>
    %cst_14 = arith.constant 0.000000e+00 : f32
    %48 = vector.broadcast %cst_14 : f32 to vector<4x256xf32>
    %49 = arith.select %47, %42, %48 : vector<4x256xi1>, vector<4x256xf32>
    %cst_15 = arith.constant dense<0.000000e+00> : vector<256xf32>
    %50 = vector.multi_reduction <add>, %49, %cst_15 [0] : vector<4x256xf32> to vector<256xf32>
    %51 = vector.shape_cast %50 : vector<256xf32> to vector<1x256xf32>
    %52 = arith.subf %51, %41 : vector<1x256xf32>
    %53 = arith.mulf %40, %52 : vector<1x256xf32>
    %54 = arith.addf %39, %53 : vector<1x256xf32>
    %55 = arith.select %14, %54, %39 : vector<1x256xi1>, vector<1x256xf32>
    %cst_16 = arith.constant 1.000000e+00 : f32
    %cst_17 = arith.constant 1.000000e+01 : f32
    %56 = vector.broadcast %cst_16 : f32 to vector<1x256xf32>
    %57 = vector.broadcast %cst_17 : f32 to vector<1x256xf32>
    %58 = arith.select %14, %56, %57 : vector<1x256xi1>, vector<1x256xf32>
    %cst_18 = arith.constant 0.000000e+00 : f32
    %59 = vector.broadcast %cst_18 : f32 to vector<1x256xf32>
    %60 = arith.select %11, %58, %59 : vector<1x256xi1>, vector<1x256xf32>
    %61 = arith.mulf %60, %55 : vector<1x256xf32>
    %cst_19 = arith.constant dense<0.000000e+00> : vector<1xf32>
    %62 = vector.multi_reduction <add>, %61, %cst_19 [1] : vector<1x256xf32> to vector<1xf32>
    %63 = vector.shape_cast %62 : vector<1xf32> to vector<1x1xf32>
    %64 = arith.extui %11 : vector<1x256xi1> to vector<1x256xi32>
    %65 = arith.sitofp %64 : vector<1x256xi32> to vector<1x256xf32>
    %cst_20 = arith.constant dense<0.000000e+00> : vector<1xf32>
    %66 = vector.multi_reduction <add>, %65, %cst_20 [1] : vector<1x256xf32> to vector<1xf32>
    %67 = vector.shape_cast %66 : vector<1xf32> to vector<1x1xf32>
    %68 = tpu.iota {dimensions = array<i32: 1>} : vector<1x128xi32>
    %c0_i32_21 = arith.constant 0 : i32
    %69 = vector.broadcast %c0_i32_21 : i32 to vector<1x128xi32>
    %70 = arith.cmpi eq, %68, %69 : vector<1x128xi32>
    %cst_22 = arith.constant 0.000000e+00 : f32
    %71 = vector.shape_cast %63 : vector<1x1xf32> to vector<1x1xf32>
    %72 = vector.broadcast %71 : vector<1x1xf32> to vector<1x128xf32>
    %73 = vector.broadcast %cst_22 : f32 to vector<1x128xf32>
    %74 = arith.select %70, %72, %73 : vector<1x128xi1>, vector<1x128xf32>
    %c1_i32 = arith.constant 1 : i32
    %75 = vector.broadcast %c1_i32 : i32 to vector<1x128xi32>
    %76 = arith.cmpi eq, %68, %75 : vector<1x128xi32>
    %cst_23 = arith.constant 0.000000e+00 : f32
    %77 = vector.shape_cast %67 : vector<1x1xf32> to vector<1x1xf32>
    %78 = vector.broadcast %77 : vector<1x1xf32> to vector<1x128xf32>
    %79 = vector.broadcast %cst_23 : f32 to vector<1x128xf32>
    %80 = arith.select %76, %78, %79 : vector<1x128xi1>, vector<1x128xf32>
    %81 = arith.addf %74, %80 : vector<1x128xf32>
    %c0_24 = arith.constant 0 : index
    %c0_25 = arith.constant 0 : index
    %c0_26 = arith.constant 0 : index
    %82 = vector.load %arg5[%c0_24, %c0_25, %c0_26] : memref<1x1x128xf32, #tpu.memory_space<vmem>>, vector<1x1x128xf32>
    %83 = vector.shape_cast %82 : vector<1x1x128xf32> to vector<1x128xf32>
    %84 = vector.shape_cast %81 : vector<1x128xf32> to vector<1x1x128xf32>
    tpu.vector_store %arg5[%c0_24, %c0_25, %c0_26], %84 {strides = array<i32>} : memref<1x1x128xf32, #tpu.memory_space<vmem>>, vector<1x1x128xf32>,
    return
  }
  func.func @transform_0(%arg0: i32, %arg1: i32) -> (i32, i32, i32) {
    %c0_i32 = arith.constant 0 : i32
    %c0_i32_0 = arith.constant 0 : i32
    return %arg0, %c0_i32, %arg1 : i32, i32, i32
  }
  func.func @transform_1(%arg0: i32, %arg1: i32) -> (i32, i32, i32) {
    %c0_i32 = arith.constant 0 : i32
    %c0_i32_0 = arith.constant 0 : i32
    return %arg0, %c0_i32, %arg1 : i32, i32, i32
  }
  func.func @transform_2(%arg0: i32, %arg1: i32) -> (i32, i32, i32) {
    %c0_i32 = arith.constant 0 : i32
    %c0_i32_0 = arith.constant 0 : i32
    return %arg0, %c0_i32, %arg1 : i32, i32, i32
  }
  func.func @transform_3(%arg0: i32, %arg1: i32) -> (i32, i32, i32) {
    %c0_i32 = arith.constant 0 : i32
    %c0_i32_0 = arith.constant 0 : i32
    return %arg0, %c0_i32, %arg1 : i32, i32, i32
  }
}

</mosaic_0001>

<bundles_post_ra>
// kernel: tpu_custom_call.1
= control target key start
LH: loop header
LB: loop body
LE: loop exit
PB: predicated region body
PF: predicated region fallthrough
CT: control target
= control target key end

     0   :  { %8 = vsyncpa [#allocation3], 0  ;;  %s998_s0 = inlined_call_operand.vmem [shape: f32[2,20,256], index: 0, kind: input, shape index: {}]   ;;  %s999_s1 = inlined_call_operand.vmem [shape: f32[2,16,256], index: 1, kind: input, shape index: {}]   ;;  %s1000_s2 = inlined_call_operand.vmem [shape: s32[2,1,256], index: 2, kind: input, shape index: {}]   ;;  %s1001_s3 = inlined_call_operand.hbm [shape: f32[2,1,128], index: 3, kind: output, shape index: {}]  }
   0x1   :  { %10 = vsyncpa [#allocation3 + $0x1], 0  ;;  %s806_s12 = smov 0   ;;  %s808_s13 = smov 0  }
   0x2   :  { %s810_s14 = smov 0   ;;  %s812_s15 = smov 0  }
   0x3   :  { %s814_s16 = smov 0   ;;  %s816_s17 = smov 0  }
   0x4 LB: > { %s605_s18 = sadd.s32 4294967295, %s782_s17   ;;  %s606_s19 = sadd.s32 4294967294, %s782_s17   ;;  %s782_s17 = sphi %s816_s17, %s16_s17   ;;  %s778_s16 = sphi %s814_s16, %s1008_s16   ;;  %s774_s15 = sphi %s812_s15, %s1007_s15   ;;  %s770_s14 = sphi %s810_s14, %s1006_s14   ;;  %s766_s13 = sphi %s808_s13, %s1005_s13   ;;  %s762_s12 = sphi %s806_s12, %s1004_s12  }
   0x5   : > { %s28_s20 = sadd.s32 1, %s778_s16  ;;  %s121_s21 = sadd.s32 1, %s770_s14 }
   0x6   : > { %p30_p0 = scmp.ge.s32.totalorder %s28_s20, 2  ;;  %p131_p1 = scmp.ne.s32.totalorder %s770_s14, %s766_s13 }
   0x7   : > { %p132_p2 = scmp.eq.s32.totalorder %s605_s18, 1  ;;  %p137_p3 = scmp.ne.s32.totalorder %s766_s13, %s762_s12 }
   0x8   : > { %s1010_s20 = smov (%p30_p0, %s28_s20), 0  ;;  %p138_p5 = scmp.eq.s32.totalorder %s606_s19, 1 }
   0x9   : > { %p846_p4 = por %p132_p2, %p131_p1  ;;  %s116_s23 = ssub.s32 %s778_s16, %s1010_s20 }
   0xa   : > { %p609_p6 = scmp.ge.s32.totalorder %s782_s17, 1  ;;  %p119_p7 = scmp.eq.s32.totalorder %s116_s23, 0 }
   0xb   : > { %p853_p8 = por %p138_p5, %p137_p3  ;;  %p194_p9 = scmp.lt.s32.totalorder %s782_s17, 3 }
   0xc   : > { %s859_s25 = scalar_select %p119_p7, %s770_s14, %s121_s21  }
   0xd   : > { %p195_p10 = pnand %p609_p6, %p194_p9 }
   0xe   : > { %p239_p11 = scmp.lt.s32.totalorder (!%p195_p10), %s774_s15, 1  ;;  %s236_s18 = sand.u32 (!%p195_p10), 1, %s766_s13  }
   0xf   : > { %198 = sbr.rel (%p195_p10) target bundleno = 249 (0xf9), region = 32  ;;  %s498_s23 = scalar_lea.hbm (!%p195_p10), %s1001_s3, %s774_s15 }
  0x10   : > { %s489_s29 = scalar_lea.sflag (!%p195_p10), [#allocation3], %s236_s18  ;;  %s724_s6 = scalar_lea.hbm (!%p195_p10), %s1001_s3, 2 }
  0x14   : > { %s863_s26 = scalar_select %p239_p11, %s774_s15, 1  ;;  %vm329_vm0 = vcmask 1043456   ;;  %vm446_vm7 = vcmask 1040384  }
  0x16   : > { %s618_s27 = smul.u32 48, %s863_s26  ;;  %s617_s28 = sshll.u32 %s863_s26, 5 }
  0x17   : > { %s256_s4 = scalar_lea.vmem %s999_s1, %s617_s28  ;;  %s613_s8 = sshll.u32 %s863_s26, 1 }
  0x18   : > { %s246_s7 = scalar_lea.vmem %s998_s0, %s618_s27  ;;  %v273_v0 = vld [vmem:[%s256_s4] sm:$0xff]  ;;  %v275_v1 = vld [vmem:[%s256_s4 + $0x10] sm:$0xff]  ;;  %v274_v4 = vld [vmem:[%s256_s4 + $0x8] sm:$0xff]  ;;  %s265_s11 = scalar_lea.vmem %s1000_s2, %s613_s8 }
  0x19   : > { %v873_v2 = vld [vmem:[%s246_s7] sm:$0xff]  ;;  %v875_v3 = vld [vmem:[%s246_s7 + $0x8] sm:$0xff]  ;;  %v283_v5 = vmax.f32 %v273_v0, %v275_v1  ;;  %v881_v8 = vld [vmem:[%s246_s7 + $0x10] sm:$0xff]  ;;  %s237_s26 = scalar_lea.vmem [#allocation2], %s236_s18  ;;  %s502_s28 = sshll.u32 %s498_s23, 4  ;;  %s503_s28 = int_to_ptr.hbm [resolvable:$true] %s502_s28 }
  0x1a   : > { %v877_v6 = vld [vmem:[%s246_s7 + $0x20] sm:$0xf]  ;;  %v879_v7 = vld [vmem:[%s246_s7 + $0x28] sm:$0xf]  ;;  %v276_v9 = vld [vmem:[%s256_s4 + $0x18] sm:$0xff]  ;;  %s500_s27 = sshll.u32 %s237_s26, 4  ;;  %s501_s27 = int_to_ptr.vmem [resolvable:$true] %s500_s27 }
  0x1b   : > { %v284_v10 = vrot.slane %v283_v5, 4  ;;  %v330_v11 = vsel %vm329_vm0, %v877_v6, -inf  ;;  %v339_v12 = vsel %vm329_vm0, %v879_v7, -inf  ;;  %v887_v13 = vld [vmem:[%s246_s7 + $0x18] sm:$0xff]  ;;  %v290_v14 = vmax.f32 %v274_v4, %v276_v9  ;;  %s718_s30 = sshra.s32 %s503_s28, 4  ;;  %s719_s30 = int_to_ptr.hbm [resolvable:$true] %s718_s30 }
  0x1c   : > { %v331_v15 = vmax.f32 %v873_v2, %v330_v11  ;;  %v340_v16 = vmax.f32 %v875_v3, %v339_v12  ;;  %s720_s4 = scalar_lea.hbm %s719_s30, 1  ;;  %p725_p1 = scmp.lt.s32.totalorder %s719_s30, %s1001_s3 }
  0x1d   : > { %v285_v17 = vmax.f32 %v283_v5, %v284_v10  ;;  %v291_v18 = vrot.slane %v290_v14, 4  ;;  %p721_p12 = scmp.ne.s32.totalorder %s719_s30, %s720_s4  ;;  %p726_p2 = scmp.lt.s32.totalorder %s724_s6, %s720_s4 }
  0x1e   : > { %v332_v19 = vmax.f32 %v331_v15, %v881_v8  ;;  %v341_v21 = vmax.f32 %v340_v16, %v887_v13 }
  0x1f   : > { %v286_v20 = vrot.slane %v285_v17, 2  ;;  %v292_v22 = vmax.f32 %v290_v14, %v291_v18  ;;  %p722_p13 = pnand %p721_p12, %p846_p4  ;;  %p727_p3 = por %p726_p2, %p725_p1 }
  0x20   : > { %v333_v23 = vrot.slane %v332_v19, 4  ;;  %v342_v25 = vrot.slane %v341_v21, 4 }
  0x21   : > { %v287_v24 = vmax.f32 %v285_v17, %v286_v20  ;;  %v293_v26 = vrot.slane %v292_v22, 2  ;;  %p723_p0 = pneg %p722_p13 }
  0x22   : > { %v334_v27 = vmax.f32 %v332_v19, %v333_v23  ;;  %v343_v29 = vmax.f32 %v341_v21, %v342_v25 }
  0x23   : > { %v288_v28 = vrot.slane %v287_v24, 1  ;;  %v294_v30 = vmax.f32 %v292_v22, %v293_v26  ;;  %p728_p5 = pnand %p727_p3, %p723_p0 }
  0x24   : > { %v335_v31 = vrot.slane %v334_v27, 2  ;;  %v344_v33 = vrot.slane %v343_v29, 2 }
  0x25   : > { %v289_v32 = vmax.f32 %v287_v24, %v288_v28  ;;  %v295_v34 = vrot.slane %v294_v30, 1 }
  0x26   : > { %v336_v35 = vmax.f32 %v334_v27, %v335_v31  ;;  %v345_v38 = vmax.f32 %v343_v29, %v344_v33 }
  0x27   : > { %v297_v36 = vsub.f32 %v273_v0, %v289_v32  ;;  %v299_v37 = vsub.f32 %v275_v1, %v289_v32  ;;  %v296_v39 = vmax.f32 %v294_v30, %v295_v34 }
  0x28   : > { %v337_v40 = vrot.slane %v336_v35, 1  ;;  %v346_v43 = vrot.slane %v345_v38, 1 }
  0x29   : > { %v301_v41 = vmul.f32 1.442695, %v297_v36  ;;  %v305_v42 = vmul.f32 1.442695, %v299_v37  ;;  %v298_v44 = vsub.f32 %v274_v4, %v296_v39  ;;  %v300_v45 = vsub.f32 %v276_v9, %v296_v39 }
  0x2a   : > { %v893_v46 = vmax.f32 %v336_v35, %v337_v40  ;;  %v895_v47 = vmax.f32 %v345_v38, %v346_v43 }
  0x2b   : > { %676 = vpow2.f32 %v301_v41  ;;  %v303_v48 = vmul.f32 1.442695, %v298_v44  ;;  %v307_v49 = vmul.f32 1.442695, %v300_v45  ;;  %v277_v44 = vld [vmem:[%s265_s11] sm:$0x3] }
  0x2c   : > { %678 = vpow2.f32 %v305_v42  ;;  %v348_v50 = vsub.f32 %v873_v2, %v893_v46  ;;  %v349_v51 = vsub.f32 %v875_v3, %v895_v47  ;;  %v350_v52 = vsub.f32 %v881_v8, %v893_v46 }
  0x2d   : > { %v351_v53 = vsub.f32 %v887_v13, %v895_v47  ;;  %v352_v54 = vsub.f32 %v877_v6, %v893_v46  ;;  %680 = vpow2.f32 %v303_v48  ;;  %v353_v55 = vsub.f32 %v879_v7, %v895_v47 }
  0x2e   : > { %v354_v56 = vmul.f32 1.442695, %v348_v50  ;;  %682 = vpow2.f32 %v307_v49  ;;  %v356_v57 = vmul.f32 1.442695, %v349_v51  ;;  %v358_v58 = vmul.f32 1.442695, %v350_v52 }
  0x2f   : > { %v360_v59 = vmul.f32 1.442695, %v351_v53  ;;  %v362_v60 = vmul.f32 1.442695, %v352_v54  ;;  %v364_v62 = vmul.f32 1.442695, %v353_v55  ;;  %v414_v49 = vlaneseq }
  0x30   : > { %684 = vpow2.f32 %v354_v56  ;;  %vm278_vm1 = vcmp.lt.s32.totalorder %v277_v44, 16 }
  0x31   : > { %v909_v61 = vpop.eup %676  ;;  %686 = vpow2.f32 %v356_v57  ;;  %v415_v50 = vshrl.u32 %v414_v49, 7  ;;  %v928_v52 = vsel %vm278_vm1, 0, %v277_v44 }
  0x32   : > { %v911_v63 = vpop.eup %678  ;;  %688 = vpow2.f32 %v358_v58  ;;  %v417_v55 = vperm.slane %v928_v52, 0  ;;  %vm280_vm4 = vcmp.ne.s32.totalorder %v928_v52, 255  ;;  %vm281_vm5 = vcmp.ge.s32.totalorder %v928_v52, 16 }
  0x33   : > { %v309_v0 = vadd.f32 %v911_v63, %v909_v61  ;;  %690 = vpow2.f32 %v360_v59  ;;  %v915_v1 = vpop.eup %680  ;;  %v416_v58 = vadd.s32 16, %v415_v50  ;;  %v418_v59 = vperm.slane %v928_v52, 1  ;;  %vm282_vm6 = vmand %vm280_vm4, %vm281_vm5 }
  0x34   : > { %692 = vpow2.f32 %v362_v60  ;;  %v917_v4 = vpop.eup %682  ;;  %v481_v52 = vand.u32 127, %v414_v49 }
  0x35   : > { %v310_v5 = vrot.slane %v309_v0, 4  ;;  %694 = vpow2.f32 %v364_v62  ;;  %v316_v10 = vadd.f32 %v917_v4, %v915_v1  ;;  %vm419_vm2 = vcmp.eq.s32.totalorder %v416_v58, %v417_v55 }
  0x36   : > { %v685_v9 = vpop.eup %684  ;;  %vm420_vm3 = vcmp.eq.s32.totalorder %v416_v58, %v418_v59  ;;  %vm482_vm8 = vcmp.eq.s32.totalorder %v481_v52, 0  ;;  %vm484_vm9 = vcmp.eq.s32.totalorder %v481_v52, 1 }
  0x37   : > { %v687_v11 = vpop.eup %686  ;;  %v311_v12 = vadd.f32 %v310_v5, %v309_v0  ;;  %v317_v15 = vrot.slane %v316_v10, 4 }
  0x38   : > { %v689_v14 = vpop.eup %688 }
  0x39   : > { %v691_v16 = vpop.eup %690  ;;  %v312_v17 = vrot.slane %v311_v12, 2  ;;  %v366_v18 = vadd.f32 %v689_v14, %v685_v9  ;;  %v318_v20 = vadd.f32 %v317_v15, %v316_v10 }
  0x3a   : > { %v693_v19 = vpop.eup %692  ;;  %v375_v21 = vadd.f32 %v691_v16, %v687_v11 }
  0x3b   : > { %v695_v22 = vpop.eup %694  ;;  %v367_v23 = vsel %vm329_vm0, %v693_v19, 0.0  ;;  %v313_v24 = vadd.f32 %v312_v17, %v311_v12  ;;  %v319_v25 = vrot.slane %v318_v20, 2 }
  0x3c   : > { %v368_v26 = vadd.f32 %v367_v23, %v366_v18  ;;  %v376_v27 = vsel %vm329_vm0, %v695_v22, 0.0 }
  0x3d   : > { %v377_v28 = vadd.f32 %v376_v27, %v375_v21  ;;  %v320_v29 = vadd.f32 %v319_v25, %v318_v20  ;;  %v314_v32 = vrot.slane %v313_v24, 1 }
  0x3e   : > { %v369_v30 = vrot.slane %v368_v26, 4 }
  0x3f   : > { %v378_v31 = vrot.slane %v377_v28, 4  ;;  %v321_v34 = vrot.slane %v320_v29, 1  ;;  %v315_v38 = vadd.f32 %v314_v32, %v313_v24 }
  0x40   : > { %v370_v33 = vadd.f32 %v369_v30, %v368_v26 }
  0x41   : > { %v379_v35 = vadd.f32 %v378_v31, %v377_v28  ;;  %v322_v40 = vadd.f32 %v321_v34, %v320_v29  ;;  %696 = vrcp.f32 %v315_v38 }
  0x42   : > { %v371_v36 = vrot.slane %v370_v33, 2 }
  0x43   : > { %v380_v37 = vrot.slane %v379_v35, 2  ;;  %698 = vrcp.f32 %v322_v40 }
  0x44   : > { %v372_v39 = vadd.f32 %v371_v36, %v370_v33 }
  0x45   : > { %v381_v41 = vadd.f32 %v380_v37, %v379_v35 }
  0x46   : > { %v373_v42 = vrot.slane %v372_v39, 1 }
  0x47   : > { %v382_v43 = vrot.slane %v381_v41, 1  ;;  %v697_v51 = vpop.eup %696 }
  0x48   : > { %v374_v45 = vadd.f32 %v373_v42, %v372_v39  ;;  %v325_v62 = vmul.f32 %v697_v51, %v909_v61  ;;  %v327_v0 = vmul.f32 %v697_v51, %v911_v63  ;;  %v784_v51 = vmov 10.0  }
  0x49   : > { %v383_v48 = vadd.f32 %v382_v43, %v381_v41  ;;  %v699_v53 = vpop.eup %698 }
  0x4a   : > { %700 = vlog2.f32 %v374_v45  ;;  %v326_v9 = vmul.f32 %v699_v53, %v915_v1  ;;  %v328_v10 = vmul.f32 %v699_v53, %v917_v4  ;;  %v455_v53 = vsel %vm282_vm6, 1.0, %v784_v51 }
  0x4b   : > { %702 = vlog2.f32 %v383_v48 }
  0x50   : > { %v701_v54 = vpop.eup %700 }
  0x51   : > { %v703_v56 = vpop.eup %702  ;;  %v385_v57 = vmul.f32 0.6931472, %v701_v54 }
  0x52   : > { %v387_v60 = vmul.f32 0.6931472, %v703_v56  ;;  %v456_v56 = vsel %vm280_vm4, %v455_v53, 0.0 }
  0x53   : > { %v388_v5 = vadd.f32 %v385_v57, %v893_v46 }
  0x54   : > { %v389_v11 = vadd.f32 %v387_v60, %v895_v47  ;;  %v785_v60 = vmov 0.0  }
  0x55   : > { %v390_v12 = vsub.f32 %v873_v2, %v388_v5  ;;  %v392_v14 = vsub.f32 %v881_v8, %v388_v5  ;;  %v394_v15 = vsub.f32 %v877_v6, %v388_v5 }
  0x56   : > { %v391_v61 = vsub.f32 %v875_v3, %v389_v11  ;;  %v393_v63 = vsub.f32 %v887_v13, %v389_v11  ;;  %v395_v46 = vsub.f32 %v879_v7, %v389_v11 }
  0x57   : > { %v396_v16 = vmul.f32 %v390_v12, %v325_v62  ;;  %v398_v1 = vmul.f32 %v392_v14, %v327_v0  ;;  %v421_v17 = vsel %vm419_vm2, %v394_v15, 0.0 }
  0x58   : > { %v397_v4 = vmul.f32 %v391_v61, %v326_v9  ;;  %v399_v18 = vmul.f32 %v393_v63, %v328_v10  ;;  %v422_v47 = vsel %vm420_vm3, %v395_v46, 0.0  ;;  %v423_v19 = vsel %vm329_vm0, %v421_v17, 0.0 }
  0x59   : > { %v400_v2 = vadd.f32 %v398_v1, %v396_v16  ;;  %v424_v20 = vrot.slane %v423_v19, 4  ;;  %v430_v8 = vsel %vm329_vm0, %v422_v47, 0.0 }
  0x5a   : > { %v407_v6 = vadd.f32 %v399_v18, %v397_v4  ;;  %v431_v21 = vrot.slane %v430_v8, 4 }
  0x5b   : > { %v401_v22 = vrot.slane %v400_v2, 4  ;;  %v425_v3 = vadd.f32 %v424_v20, %v423_v19 }
  0x5c   : > { %v408_v23 = vrot.slane %v407_v6, 4  ;;  %v432_v13 = vadd.f32 %v431_v21, %v430_v8 }
  0x5d   : > { %v402_v24 = vadd.f32 %v401_v22, %v400_v2  ;;  %v426_v7 = vrot.slane %v425_v3, 2 }
  0x5e   : > { %v409_v25 = vadd.f32 %v408_v23, %v407_v6  ;;  %v433_v26 = vrot.slane %v432_v13, 2 }
  0x5f   : > { %v403_v27 = vrot.slane %v402_v24, 2  ;;  %v427_v28 = vadd.f32 %v426_v7, %v425_v3 }
  0x60   : > { %v410_v29 = vrot.slane %v409_v25, 2  ;;  %v434_v30 = vadd.f32 %v433_v26, %v432_v13 }
  0x61   : > { %v404_v31 = vadd.f32 %v403_v27, %v402_v24  ;;  %v428_v32 = vrot.slane %v427_v28, 1 }
  0x62   : > { %v411_v33 = vadd.f32 %v410_v29, %v409_v25  ;;  %v435_v34 = vrot.slane %v434_v30, 1 }
  0x63   : > { %v405_v35 = vrot.slane %v404_v31, 1  ;;  %v429_v36 = vadd.f32 %v428_v32, %v427_v28 }
  0x64   : > { %v412_v37 = vrot.slane %v411_v33, 1  ;;  %v436_v38 = vadd.f32 %v435_v34, %v434_v30 }
  0x65   : > { %v437_v39 = vsub.f32 %v429_v36, %v390_v12  ;;  %v406_v40 = vadd.f32 %v405_v35, %v404_v31 }
  0x66   : > { %v413_v41 = vadd.f32 %v412_v37, %v411_v33  ;;  %v438_v42 = vsub.f32 %v436_v38, %v391_v61 }
  0x67   : > { %v439_v43 = vmul.f32 %v437_v39, %v325_v62  ;;  %v614_v62 = vsel %vm280_vm4, 1.0, %v785_v60 }
  0x68   : > { %v440_v44 = vmul.f32 %v438_v42, %v326_v9  ;;  %v451_v45 = vrot.slane %v413_v41, 7  ;;  %v471_v11 = vperm.slane %v614_v62, 0  ;;  %v472_v12 = vperm.slane %v614_v62, 1 }
  0x69   : > { %v441_v48 = vadd.f32 %v439_v43, %v406_v40 }
  0x6a   : > { %v442_v50 = vadd.f32 %v440_v44, %v413_v41  ;;  %v452_v55 = vsel %vm446_vm7, %v406_v40, %v451_v45  ;;  %v475_v15 = vsel %vm446_vm7, %v471_v11, 0.0  ;;  %v476_v61 = vsel %vm446_vm7, %v472_v12, 0.0 }
  0x6b   : > { %v477_v63 = vadd.f32 %v476_v61, %v475_v15 }
  0x6c   : > { %v445_v54 = vrot.slane %v442_v50, 7 }
  0x6e   : > { %v447_v57 = vsel %vm446_vm7, %v441_v48, %v445_v54 }
  0x6f   : > { %v454_v58 = vsel %vm282_vm6, %v447_v57, %v452_v55 }
  0x70   : > { %v457_v59 = vmul.f32 %v456_v56, %v454_v58 }
  0x72   : > { %v459_v0 = vperm.slane %v457_v59, 0  ;;  %v460_v5 = vperm.slane %v457_v59, 1 }
  0x74   : > { %v463_v9 = vsel %vm446_vm7, %v459_v0, 0.0  ;;  %v464_v10 = vsel %vm446_vm7, %v460_v5, 0.0 }
  0x75   : > { %v465_v14 = vadd.f32 %v464_v10, %v463_v9 }
  0x77   : > { %466 = vadd.xlane.f32.xlu0 %v465_v14 }
  0x7f   : > { %478 = vadd.xlane.f32.xlu0 %v477_v63 }
  0xea   : > { %v467_v46 = vpop.xlane.xlu0 %466 }
  0xeb   : > { %v483_v1 = vsel %vm482_vm8, %v467_v46, 0.0 }
  0xf2   : > { %v479_v16 = vpop.xlane.xlu0 %478 }
  0xf3   : > { %v485_v17 = vsel %vm484_vm9, %v479_v16, 0.0 }
  0xf4   : > { %v486_v4 = vadd.f32 %v485_v17, %v483_v1 }
  0xf6   : > { %487 = vst [vmem:[%s237_s26] sm:$0x1] %v486_v4 }
  0xf7   : > { %731 = shalt.err (!%p728_p5)
}
  0xf8   : > { %619 = dma.vmem_to_hbm [thread:$0]  (%p846_p4), %s501_s27, 16, %s503_s28, %s489_s29  }
  0xf9 PF: > { %p625_p6 = scmp.ge.s32.totalorder %s782_s17, 2  ;;  %s514_s9 = sand.u32 1, %s762_s12  }
  0xfa   : > { %s515_s10 = scalar_lea.sflag [#allocation3], %s514_s9 }
  0xfb   : > { %p622_p7 = pnand %p625_p6, %p853_p8 }
  0xfd   : > { %p623_p9 = pneg %p622_p7 }
  0xff   : > { %757 = dma.done.wait (%p623_p9), %s515_s10, 16  }
 0x100   : > { %759 = vsyncadd (%p623_p9), %s515_s10, 4294967280  ;;  %s16_s17 = sadd.s32 1, %s782_s17   ;;  %s1004_s12 = smov %s766_s13 }
 0x101   : > { %p13_p10 = scmp.ge.s32.totalorder %s16_s17, 4   ;;  %s1005_s13 = smov %s770_s14 }
 0x102   : > { %s1006_s14 = smov %s859_s25  ;;  %s1007_s15 = smov %s778_s16 }
 0x103   : > { %s1008_s16 = smov %s1010_s20  ;;  %15 = sbr.rel (!%p13_p10) target bundleno = 4 (0x4), region = 73 }
 0x108   :  { %520 = vsyncpa [#allocation3], 1 }
 0x109   :  { %522 = vsyncpa [#allocation3 + $0x1], 1 }

</bundles_post_ra>
